<compile_context>
chip_gen: v6e
topology: v6e:2x2x1
jax: 0.10.0
libtpu: 0.0.40
codegen_flags: <defaults>
</compile_context>

<pallas_src>
import functools

import jax
import jax.numpy as jnp
from jax import lax
from jax.experimental import pallas as pl
from jax.experimental.pallas import tpu as pltpu


def _loan_mlp_kernel(x_ref, w1_ref, b1_ref, w2_ref, b2_ref, w3_ref, b3_ref, o_ref):
    x = x_ref[...].astype(jnp.float32)                        # [TB, F], batch on sublanes

    # fc1 + ReLU: contract the feature axis of both operands -> [28, TB].
    # The implied transpose of the big x tile happens on-chip, not in HBM.
    h1 = lax.dot_general(w1_ref[...], x, (((1,), (1,)), ((), ())),
                         preferred_element_type=jnp.float32) + b1_ref[...]
    h1 = jnp.maximum(h1, 0.0)

    # fc2 + ReLU -> [14, TB]
    h2 = jnp.dot(w2_ref[...], h1, preferred_element_type=jnp.float32) + b2_ref[...]
    h2 = jnp.maximum(h2, 0.0)

    # output + sigmoid -> [1, TB] (lane-dense store)
    z = jnp.dot(w3_ref[...], h2, preferred_element_type=jnp.float32) + b3_ref[...]
    sig = pl.reciprocal(1.0 + jnp.exp(-z), approx=True)        # exp + recip on EUP
    o_ref[...] = sig.astype(o_ref.dtype)


def _round_up(n, m):
    return ((n + m - 1) // m) * m


@functools.partial(jax.jit, static_argnames=("tb",))
def loan_approval_forward(x, params, *, tb=8192):
    """x: [B, input_size]; params: dict of w1,b1,w2,b2,w3,b3 (w* are [in, out])."""
    B, F = x.shape

    # Only the *tiny* weights/biases are reshaped in the wrapper; x is untouched.
    w1t = params["w1"].T                      # [28, F]
    w2t = params["w2"].T                      # [14, 28]
    w3t = params["w3"].T                      # [1, 14]
    b1c = params["b1"].reshape(-1, 1)         # [28, 1]
    b2c = params["b2"].reshape(-1, 1)         # [14, 1]
    b3c = params["b3"].reshape(-1, 1)         # [1, 1]

    # Batch tile: big enough to amortize per-step overhead, capped so large
    # batches produce >= 2 grid tiles (keeps both v7x TensorCores busy).
    TB = min(tb, _round_up(pl.cdiv(B, 2), 128))
    grid = (pl.cdiv(B, TB),)                  # partial last block handled by Pallas

    full = lambda a: pl.BlockSpec(a.shape, lambda i, _s=a.shape: (0,) * len(_s))

    out = pl.pallas_call(
        _loan_mlp_kernel,
        out_shape=jax.ShapeDtypeStruct((1, B), jnp.float32),
        grid=grid,
        in_specs=[
            pl.BlockSpec((TB, F), lambda i: (i, 0)),   # x streamed as-is, no HBM transpose
            full(w1t), full(b1c),
            full(w2t), full(b2c),
            full(w3t), full(b3c),
        ],
        out_specs=pl.BlockSpec((1, TB), lambda i: (0, i)),
        compiler_params=pltpu.CompilerParams(
            dimension_semantics=("parallel",),          # shard batch tiles across TCs
            vmem_limit_bytes=32 * 1024 * 1024,          # headroom; safe on v5e/v6e/v7x
        ),
    )(x, w1t, b1c, w2t, b2c, w3t, b3c)

    # (1, B) -> (B, 1): pure reshape, no HBM transpose / no padded columns to slice.
    return out.reshape(B, 1)


def init_params(key, input_size):
    """Deterministic init mimicking nn.Linear's U(-1/sqrt(fan_in), 1/sqrt(fan_in))."""
    def linear(k, fan_in, fan_out):
        kw, kb = jax.random.split(k)
        bound = 1.0 / jnp.sqrt(fan_in)
        w = jax.random.uniform(kw, (fan_in, fan_out), jnp.float32, -bound, bound)
        b = jax.random.uniform(kb, (1, fan_out), jnp.float32, -bound, bound)
        return w, b

    k1, k2, k3 = jax.random.split(key, 3)
    w1, b1 = linear(k1, input_size, 28)
    w2, b2 = linear(k2, 28, 14)
    w3, b3 = linear(k3, 14, 1)
    return {"w1": w1, "b1": b1, "w2": w2, "b2": b2, "w3": w3, "b3": b3}


def reference_forward(x, p):
    h1 = jnp.maximum(x @ p["w1"] + p["b1"], 0.0)
    h2 = jnp.maximum(h1 @ p["w2"] + p["b2"], 0.0)
    return jax.nn.sigmoid(h2 @ p["w3"] + p["b3"])


if __name__ == "__main__":
    key = jax.random.PRNGKey(0)
    k_x, k_p = jax.random.split(key)

    batch, input_size = 8, 16
    x = jax.random.normal(k_x, (batch, input_size), jnp.float32)
    params = init_params(k_p, input_size)

    out = loan_approval_forward(x, params)
    out = jax.block_until_ready(out)

    ref = reference_forward(x, params)
    assert out.shape == (batch, 1)
    # approx=True reciprocal on the EUP has ~1e-5-scale relative error; sigmoid
    # outputs are in (0, 1), so 1e-3 tolerance is a comfortable bound.
    assert jnp.allclose(out, ref, atol=1e-3, rtol=1e-3)
    print("KERNEL_OK")
</pallas_src>

<mosaic_0001>
module attributes {stable_mosaic.version = 11 : i64} {
  func.func @_loan_mlp_kernel(%arg0: i32, %arg1: memref<128x16xf32, #tpu.memory_space<vmem>>, %arg2: memref<28x16xf32, #tpu.memory_space<vmem>>, %arg3: memref<28x1xf32, #tpu.memory_space<vmem>>, %arg4: memref<14x28xf32, #tpu.memory_space<vmem>>, %arg5: memref<14x1xf32, #tpu.memory_space<vmem>>, %arg6: memref<1x14xf32, #tpu.memory_space<vmem>>, %arg7: memref<1x1xf32, #tpu.memory_space<vmem>>, %arg8: memref<1x128xf32, #tpu.memory_space<vmem>>) attributes {dimension_semantics = [#tpu.dimension_semantics<parallel>], iteration_bounds = array<i64: 1>, scalar_prefetch = 0 : i64, scratch_operands = 0 : i64, tpu.core_type = #tpu.core_type<tc>, window_params = [{transform_indices = @transform_0, window_bounds = array<i64: 128, 16>}, {pipeline_mode = #tpu.pipeline_mode<synchronous>, transform_indices = @transform_1, window_bounds = array<i64: 28, 16>}, {pipeline_mode = #tpu.pipeline_mode<synchronous>, transform_indices = @transform_2, window_bounds = array<i64: 28, 1>}, {pipeline_mode = #tpu.pipeline_mode<synchronous>, transform_indices = @transform_3, window_bounds = array<i64: 14, 28>}, {pipeline_mode = #tpu.pipeline_mode<synchronous>, transform_indices = @transform_4, window_bounds = array<i64: 14, 1>}, {pipeline_mode = #tpu.pipeline_mode<synchronous>, transform_indices = @transform_5, window_bounds = array<i64: 1, 14>}, {pipeline_mode = #tpu.pipeline_mode<synchronous>, transform_indices = @transform_6, window_bounds = array<i64: 1, 1>}, {transform_indices = @transform_7, window_bounds = array<i64: 1, 128>}]} {
    %c0 = arith.constant 0 : index
    %c0_0 = arith.constant 0 : index
    %0 = vector.load %arg1[%c0, %c0_0] : memref<128x16xf32, #tpu.memory_space<vmem>>, vector<128x16xf32>
    %c0_1 = arith.constant 0 : index
    %c0_2 = arith.constant 0 : index
    %1 = vector.load %arg2[%c0_1, %c0_2] : memref<28x16xf32, #tpu.memory_space<vmem>>, vector<28x16xf32>
    %cst = arith.constant dense<0.000000e+00> : vector<28x128xf32>
    %2 = tpu.matmul %1, %0, %cst {dimension_numbers = #tpu.dot_dimension_numbers<[1], [1], [0], [0], [0, 0, 1, 0], [], []>} : vector<28x16xf32>, vector<128x16xf32>, vector<28x128xf32> -> vector<28x128xf32>
    %c0_3 = arith.constant 0 : index
    %c0_4 = arith.constant 0 : index
    %3 = vector.load %arg3[%c0_3, %c0_4] : memref<28x1xf32, #tpu.memory_space<vmem>>, vector<28x1xf32>
    %4 = vector.broadcast %3 : vector<28x1xf32> to vector<28x128xf32>
    %5 = arith.addf %2, %4 : vector<28x128xf32>
    %cst_5 = arith.constant 0.000000e+00 : f32
    %6 = vector.broadcast %cst_5 : f32 to vector<28x128xf32>
    %7 = arith.maximumf %5, %6 : vector<28x128xf32>
    %c0_6 = arith.constant 0 : index
    %c0_7 = arith.constant 0 : index
    %8 = vector.load %arg4[%c0_6, %c0_7] : memref<14x28xf32, #tpu.memory_space<vmem>>, vector<14x28xf32>
    %cst_8 = arith.constant dense<0.000000e+00> : vector<14x128xf32>
    %9 = tpu.matmul %8, %7, %cst_8 {dimension_numbers = #tpu.dot_dimension_numbers<[1], [0], [0], [1], [0, 0, 1, 1], [], []>} : vector<14x28xf32>, vector<28x128xf32>, vector<14x128xf32> -> vector<14x128xf32>
    %c0_9 = arith.constant 0 : index
    %c0_10 = arith.constant 0 : index
    %10 = vector.load %arg5[%c0_9, %c0_10] : memref<14x1xf32, #tpu.memory_space<vmem>>, vector<14x1xf32>
    %11 = vector.broadcast %10 : vector<14x1xf32> to vector<14x128xf32>
    %12 = arith.addf %9, %11 : vector<14x128xf32>
    %cst_11 = arith.constant 0.000000e+00 : f32
    %13 = vector.broadcast %cst_11 : f32 to vector<14x128xf32>
    %14 = arith.maximumf %12, %13 : vector<14x128xf32>
    %c0_12 = arith.constant 0 : index
    %c0_13 = arith.constant 0 : index
    %15 = vector.load %arg6[%c0_12, %c0_13] : memref<1x14xf32, #tpu.memory_space<vmem>>, vector<1x14xf32>
    %cst_14 = arith.constant dense<0.000000e+00> : vector<1x128xf32>
    %16 = tpu.matmul %15, %14, %cst_14 {dimension_numbers = #tpu.dot_dimension_numbers<[1], [0], [0], [1], [0, 0, 1, 1], [], []>} : vector<1x14xf32>, vector<14x128xf32>, vector<1x128xf32> -> vector<1x128xf32>
    %c0_15 = arith.constant 0 : index
    %c0_16 = arith.constant 0 : index
    %17 = vector.load %arg7[%c0_15, %c0_16] : memref<1x1xf32, #tpu.memory_space<vmem>>, vector<1x1xf32>
    %18 = vector.broadcast %17 : vector<1x1xf32> to vector<1x128xf32>
    %19 = arith.addf %16, %18 : vector<1x128xf32>
    %cst_17 = arith.constant 0.000000e+00 : f32
    %20 = vector.broadcast %cst_17 : f32 to vector<1x128xf32>
    %21 = arith.subf %20, %19 : vector<1x128xf32>
    %22 = math.exp %21 : vector<1x128xf32>
    %cst_18 = arith.constant 1.000000e+00 : f32
    %23 = vector.broadcast %cst_18 : f32 to vector<1x128xf32>
    %24 = arith.addf %23, %22 : vector<1x128xf32>
    %25 = tpu.reciprocal %24 {approx = true} : vector<1x128xf32> -> vector<1x128xf32>
    %c0_19 = arith.constant 0 : index
    %c0_20 = arith.constant 0 : index
    %26 = vector.load %arg8[%c0_19, %c0_20] : memref<1x128xf32, #tpu.memory_space<vmem>>, vector<1x128xf32>
    tpu.vector_store %arg8[%c0_19, %c0_20], %25 {strides = array<i32>} : memref<1x128xf32, #tpu.memory_space<vmem>>, vector<1x128xf32>,
    return
  }
  func.func @transform_0(%arg0: i32) -> (i32, i32) {
    %c0_i32 = arith.constant 0 : i32
    %c0_i32_0 = arith.constant 0 : i32
    return %arg0, %c0_i32 : i32, i32
  }
  func.func @transform_1(%arg0: i32) -> (i32, i32) {
    %c0_i32 = arith.constant 0 : i32
    %c0_i32_0 = arith.constant 0 : i32
    %c0_i32_1 = arith.constant 0 : i32
    return %c0_i32, %c0_i32_0 : i32, i32
  }
  func.func @transform_2(%arg0: i32) -> (i32, i32) {
    %c0_i32 = arith.constant 0 : i32
    %c0_i32_0 = arith.constant 0 : i32
    %c0_i32_1 = arith.constant 0 : i32
    return %c0_i32, %c0_i32_0 : i32, i32
  }
  func.func @transform_3(%arg0: i32) -> (i32, i32) {
    %c0_i32 = arith.constant 0 : i32
    %c0_i32_0 = arith.constant 0 : i32
    %c0_i32_1 = arith.constant 0 : i32
    return %c0_i32, %c0_i32_0 : i32, i32
  }
  func.func @transform_4(%arg0: i32) -> (i32, i32) {
    %c0_i32 = arith.constant 0 : i32
    %c0_i32_0 = arith.constant 0 : i32
    %c0_i32_1 = arith.constant 0 : i32
    return %c0_i32, %c0_i32_0 : i32, i32
  }
  func.func @transform_5(%arg0: i32) -> (i32, i32) {
    %c0_i32 = arith.constant 0 : i32
    %c0_i32_0 = arith.constant 0 : i32
    %c0_i32_1 = arith.constant 0 : i32
    return %c0_i32, %c0_i32_0 : i32, i32
  }
  func.func @transform_6(%arg0: i32) -> (i32, i32) {
    %c0_i32 = arith.constant 0 : i32
    %c0_i32_0 = arith.constant 0 : i32
    %c0_i32_1 = arith.constant 0 : i32
    return %c0_i32, %c0_i32_0 : i32, i32
  }
  func.func @transform_7(%arg0: i32) -> (i32, i32) {
    %c0_i32 = arith.constant 0 : i32
    %c0_i32_0 = arith.constant 0 : i32
    return %c0_i32, %arg0 : i32, i32
  }
}

</mosaic_0001>

<bundles_post_ra>
// kernel: loan_approval_forward.1
= control target key start
LH: loop header
LB: loop body
LE: loop exit
PB: predicated region body
PF: predicated region fallthrough
CT: control target
= control target key end

     0   :  { %s751_s0 = inlined_call_operand.vmem [shape: f32[8,16], index: 0, kind: input, shape index: {}]   ;;  %s752_s1 = inlined_call_operand.vmem [shape: f32[28,16], index: 1, kind: input, shape index: {}]   ;;  %s753_s2 = inlined_call_operand.vmem [shape: f32[28,1], index: 2, kind: input, shape index: {}]   ;;  %s754_s3 = inlined_call_operand.vmem [shape: f32[14,28], index: 3, kind: input, shape index: {}]   ;;  %s755_s4 = inlined_call_operand.vmem [shape: f32[14,1], index: 4, kind: input, shape index: {}]   ;;  %s756_s5 = inlined_call_operand.vmem [shape: f32[1,14], index: 5, kind: input, shape index: {}]   ;;  %s757_s6 = inlined_call_operand.<no memory space> [shape: f32[1,1], index: 6, kind: input, shape index: {}]   ;;  %s758_s7 = inlined_call_operand.hbm [shape: f32[1,8], index: 7, kind: output, shape index: {}]  }
   0x1   :  { %v12_v0 = vstv %s757_s6 }
   0x2   :  { %13 = vst [vmem:[#allocation2] sm:$0x1] %v12_v0 }
   0x3   :  { %v44_v1 = vld [vmem:[%s751_s0 + $0x78] sm:$0xff]  ;;  %vm73_vm0 = vcmask 130048   ;;  %v43_v2 = vld [vmem:[%s751_s0 + $0x70] sm:$0xff]  ;;  %v576_v3 = vmov 0   ;;  %v42_v4 = vld [vmem:[%s751_s0 + $0x68] sm:$0xff] }
   0x4   :  { %488 = vmatprep.subr.msk.mxu0 %vm73_vm0, %v44_v1  ;;  %548 = vset.pattern.permute.xlu0 %v576_v3  ;;  %v45_v5 = vld [vmem:[%s752_s1] sm:$0xff]  ;;  %v52_v6 = vld [vmem:[%s753_s2 + $0x18] sm:$0xf]  ;;  %v50_v7 = vld [vmem:[%s753_s2 + $0x8] sm:$0xff] }
   0x5   :  { %489 = vmatpush3.xpose.msk.msra.mxu0 %vm73_vm0, %v44_v1  ;;  %549 = vset.pattern.permute.xlu1 %v576_v3  ;;  %v41_v8 = vld [vmem:[%s751_s0 + $0x60] sm:$0xff]  ;;  %v51_v9 = vld [vmem:[%s753_s2 + $0x10] sm:$0xff] }
   0x6   :  { %490 = vmatprep.subr.msk.mxu0 %vm73_vm0, %v43_v2  ;;  %520 = vmatprep.mubr.msk.f32.mxu0 %vm73_vm0, %v45_v5  ;;  %v49_v10 = vld [vmem:[%s753_s2] sm:$0xff] }
   0x7   :  { %70 = vperm.xlu0 %548, %v52_v6   ;;  %60 = vperm.xlu1 %549, %v50_v7  }
   0x9   :  { %491 = vmatpush3.xpose.msk.msra.mxu0 %vm73_vm0, %v43_v2 }
   0xa   :  { %492 = vmatprep.subr.msk.mxu0 %vm73_vm0, %v42_v4 }
   0xb   :  { %14 = vsyncpa [#allocation4], 0  ;;  %65 = vperm.xlu0 %548, %v51_v9   ;;  %v40_v11 = vld [vmem:[%s751_s0 + $0x58] sm:$0xff]  ;;  %v226_v12 = vld [vmem:[%s755_s4 + $0x8] sm:$0x3f]  ;;  %55 = vperm.xlu1 %549, %v49_v10   ;;  %vm237_vm1 = vcmask 228352   ;;  %v332_v57 = vlaneseq }
   0xc   :  { %v225_v13 = vld [vmem:[%s755_s4] sm:$0xff]  ;;  %v39_v14 = vld [vmem:[%s751_s0 + $0x50] sm:$0xff]  ;;  %v38_v16 = vld [vmem:[%s751_s0 + $0x48] sm:$0xff]  ;;  %vm244_vm2 = vcmask 1043456   ;;  %v577_v47 = vmov 0.0   ;;  %vm578_vm3 = vmmov 0  }
   0xd   :  { %493 = vmatpush3.xpose.msk.msra.mxu0 %vm73_vm0, %v42_v4  ;;  %v326_v15 = vld [vmem:[#allocation2] sm:$0x1]  ;;  %v36_v18 = vld [vmem:[%s751_s0 + $0x38] sm:$0xff]  ;;  %v35_v19 = vld [vmem:[%s751_s0 + $0x30] sm:$0xff]  ;;  %vm340_vm4 = vcmask 1045504   ;;  %vm336_vm5 = vcmask 113664  }
   0xe   :  { %494 = vmatprep.subr.msk.mxu0 %vm73_vm0, %v41_v8  ;;  %v37_v17 = vld [vmem:[%s751_s0 + $0x40] sm:$0xff]  ;;  %v34_v20 = vld [vmem:[%s751_s0 + $0x28] sm:$0xff]  ;;  %v32_v22 = vld [vmem:[%s751_s0 + $0x18] sm:$0xff]  ;;  %v333_v58 = vshrl.u32 %v332_v57, 7  ;;  %s579_s29 = smov [#allocation3]  }
   0xf   :  { %234 = vperm.xlu0 %548, %v226_v12   ;;  %229 = vperm.xlu1 %549, %v225_v13   ;;  %v33_v21 = vld [vmem:[%s751_s0 + $0x20] sm:$0xff]  ;;  %v31_v23 = vld [vmem:[%s751_s0 + $0x10] sm:$0xff]  ;;  %v30_v24 = vld [vmem:[%s751_s0 + $0x8] sm:$0xff] }
  0x10   :  { %v29_v25 = vld [vmem:[%s751_s0] sm:$0xff]  ;;  %v46_v26 = vld [vmem:[%s752_s1 + $0x8] sm:$0xff]  ;;  %v47_v27 = vld [vmem:[%s752_s1 + $0x10] sm:$0xff]  ;;  %v334_v59 = vsub.s32 0, %v333_v58 }
  0x11   :  { %495 = vmatpush3.xpose.msk.msra.mxu0 %vm73_vm0, %v41_v8  ;;  %v48_v28 = vld [vmem:[%s752_s1 + $0x18] sm:$0xf]  ;;  %v223_v29 = vld [vmem:[%s754_s3] sm:$0xff]  ;;  %v224_v46 = vld [vmem:[%s754_s3 + $0x8] sm:$0x3f] }
  0x12   :  { %496 = vmatprep.subr.msk.mxu0 %vm73_vm0, %v40_v11  ;;  %534 = vmatprep.mubr.msk.f32.mxu1 %vm237_vm1, %v223_v29  ;;  %v325_v56 = vld [vmem:[%s756_s5] sm:$0x1]  ;;  %s426_s5 = sshll.u32 %s579_s29, 4  ;;  %s427_s5 = int_to_ptr.vmem [resolvable:$true] %s426_s5 }
  0x13   :  { %329 = vperm.xlu0 %548, %v326_v15   ;;  %s554_s6 = scalar_lea.vmem %s427_s5, 16  ;;  %s558_s30 = scalar_lea.vmem %s427_s5, 32 }
  0x14   :  { %p555_p0 = scmp.ne.s32.totalorder %s427_s5, %s554_s6  ;;  %p559_p1 = scmp.lt.s32.totalorder %s427_s5, %s427_s5 }
  0x15   :  { %497 = vmatpush3.xpose.msk.msra.mxu0 %vm73_vm0, %v40_v11  ;;  %p560_p2 = scmp.lt.s32.totalorder %s558_s30, %s554_s6 }
  0x16   :  { %498 = vmatprep.subr.msk.mxu0 %vm73_vm0, %v39_v14 }
  0x17   :  { %p561_p3 = por %p560_p2, %p559_p1 }
  0x19   :  { %499 = vmatpush3.xpose.msk.msra.mxu0 %vm73_vm0, %v39_v14  ;;  %p562_p4 = pnand %p561_p3, %p555_p0 }
  0x1a   :  { %500 = vmatprep.subr.msk.mxu0 %vm73_vm0, %v38_v16 }
  0x1d   :  { %501 = vmatpush3.xpose.msk.msra.mxu0 %vm73_vm0, %v38_v16 }
  0x1e   :  { %502 = vmatprep.subr.msk.mxu0 %vm73_vm0, %v37_v17 }
  0x21   :  { %503 = vmatpush3.xpose.msk.msra.mxu0 %vm73_vm0, %v37_v17 }
  0x22   :  { %504 = vmatprep.subr.msk.mxu0 %vm73_vm0, %v36_v18 }
  0x25   :  { %505 = vmatpush3.xpose.msk.msra.mxu0 %vm73_vm0, %v36_v18 }
  0x26   :  { %506 = vmatprep.subr.msk.mxu0 %vm73_vm0, %v35_v19 }
  0x29   :  { %507 = vmatpush3.xpose.msk.msra.mxu0 %vm73_vm0, %v35_v19 }
  0x2a   :  { %508 = vmatprep.subr.msk.mxu0 %vm73_vm0, %v34_v20 }
  0x2d   :  { %509 = vmatpush3.xpose.msk.msra.mxu0 %vm73_vm0, %v34_v20 }
  0x2e   :  { %510 = vmatprep.subr.msk.mxu0 %vm73_vm0, %v33_v21 }
  0x31   :  { %511 = vmatpush3.xpose.msk.msra.mxu0 %vm73_vm0, %v33_v21 }
  0x32   :  { %512 = vmatprep.subr.msk.mxu0 %vm73_vm0, %v32_v22 }
  0x35   :  { %513 = vmatpush3.xpose.msk.msra.mxu0 %vm73_vm0, %v32_v22 }
  0x36   :  { %514 = vmatprep.subr.msk.mxu0 %vm73_vm0, %v31_v23 }
  0x39   :  { %515 = vmatpush3.xpose.msk.msra.mxu0 %vm73_vm0, %v31_v23 }
  0x3a   :  { %516 = vmatprep.subr.msk.mxu0 %vm73_vm0, %v30_v24 }
  0x3d   :  { %517 = vmatpush3.xpose.msk.msra.mxu0 %vm73_vm0, %v30_v24 }
  0x3e   :  { %518 = vmatprep.subr.msk.mxu0 %vm73_vm0, %v29_v25 }
  0x41   :  { %519 = vmatpush3.xpose.msk.msra.mxu0 %vm73_vm0, %v29_v25 }
  0x44   :  { %521 = vmatmul.mubr.msk.f32.vlgmr.msra.gmra.mxu0 %vm73_vm0, %v46_v26 }
  0x45   :  { %523 = vmatprep.mubr.msk.f32.mxu0 %vm73_vm0, %v47_v27 }
  0x48   :  { %524 = vmatmul.mubr.msk.f32.gmra.mxu0 %vm73_vm0, %v48_v28 }
  0x82   :  { %v71_v30 = vpop.permute.xlu0 %70  ;;  %v61_v31 = vpop.permute.xlu1 %60 }
  0x86   :  { %v66_v35 = vpop.permute.xlu0 %65  ;;  %v56_v37 = vpop.permute.xlu1 %55 }
  0x8a   :  { %v235_v48 = vpop.permute.xlu0 %234  ;;  %v230_v51 = vpop.permute.xlu1 %229 }
  0x8e   :  { %v330_v60 = vpop.permute.xlu0 %329 }
  0x8f   :  { %v335_v61 = vrot.slane %v330_v60, %v334_v59 }
 0x104   :  { %v522_v32 = vpop.f32.mrf.mxu0 }
 0x105   :  { %v206_v39 = vadd.f32 %v522_v32, %v61_v31 }
 0x106   :  { %v200_v33 = vpop.f32.mrf.mxu0 }
 0x107   :  { %v201_v42 = vadd.f32 %v200_v33, %v56_v37  ;;  %v220_v44 = vmax.f32 %v206_v39, 0.0 }
 0x108   :  { %v525_v34 = vpop.f32.mrf.mxu0 }
 0x109   :  { %v216_v36 = vadd.f32 %v525_v34, %v71_v30  ;;  %v219_v45 = vmax.f32 %v201_v42, 0.0 }
 0x10a   :  { %v210_v38 = vpop.f32.mrf.mxu0 }
 0x10b   :  { %v222_v40 = vmax.f32 %v216_v36, 0.0  ;;  %v211_v41 = vadd.f32 %v210_v38, %v66_v35 }
 0x10d   :  { %v221_v43 = vmax.f32 %v211_v41, 0.0  ;;  %526 = vmatprep.subr.msk.mxu1 %vm244_vm2, %v222_v40 }
 0x10e   :  { %527 = vmatpush3.msk.msra.mxu1 %vm244_vm2, %v222_v40 }
 0x10f   :  { %528 = vmatprep.subr.mxu1 %v221_v43 }
 0x110   :  { %529 = vmatpush3.msra.mxu1 %v221_v43 }
 0x111   :  { %530 = vmatprep.subr.mxu1 %v220_v44 }
 0x112   :  { %531 = vmatpush3.msra.mxu1 %v220_v44 }
 0x113   :  { %532 = vmatprep.subr.mxu1 %v219_v45 }
 0x114   :  { %533 = vmatpush3.msra.mxu1 %v219_v45 }
 0x115   :  { %535 = vmatmul.mubr.msk.f32.vlgmr.msra.gmra.mxu1 %vm237_vm1, %v224_v46  ;;  %537 = vmatprep.subr.mxu1 %v577_v47 }
 0x116   :  { %541 = vmatprep.mubr.msk.f32.mxu1 %vm578_vm3, %v577_v47 }
 0x1d5   :  { %v536_v49 = vpop.f32.mrf.mxu1 }
 0x1d6   :  { %v320_v50 = vadd.f32 %v536_v49, %v235_v48 }
 0x1d7   :  { %v314_v52 = vpop.f32.mrf.mxu1 }
 0x1d8   :  { %v324_v53 = vmax.f32 %v320_v50, 0.0  ;;  %v315_v54 = vadd.f32 %v314_v52, %v230_v51 }
 0x1da   :  { %v323_v55 = vmax.f32 %v315_v54, 0.0  ;;  %538 = vmatpush3.msk.msra.mxu1 %vm340_vm4, %v324_v53 }
 0x1db   :  { %539 = vmatprep.subr.mxu1 %v577_v47 }
 0x1dc   :  { %540 = vmatpush3.msra.mxu1 %v323_v55 }
 0x1dd   :  { %542 = vmatmul.mubr.msk.f32.vlgmr.msra.gmra.mxu1 %vm336_vm5, %v325_v56 }
 0x29d   :  { %v410_v62 = vpop.f32.mrf.mxu1 }
 0x29e   :  { %v411_v63 = vadd.f32 %v410_v62, %v335_v61 }
 0x29f   :  { %v543_v0 = vpop.f32.mrf.mxu1 }
 0x2a0   :  { %v414_v1 = vsub.f32 0.0, %v411_v63 }
 0x2a2   :  { %v415_v2 = vmul.f32 1.442695, %v414_v1 }
 0x2a4   :  { %550 = vpow2.f32 %v415_v2 }
 0x2b1   :  { %v551_v3 = vpop.eup %550 }
 0x2b2   :  { %v417_v4 = vadd.f32 1.0, %v551_v3 }
 0x2b4   :  { %552 = vrcp.f32 %v417_v4 }
 0x2c1   :  { %v553_v5 = vpop.eup %552 }
 0x2c2   :  { %419 = vst [vmem:[#allocation3] sm:$0x1] %v553_v5 }
 0x2c3   :  { %565 = shalt.err (!%p562_p4)
}
 0x2c4   :  { %429 = dma.vmem_to_hbm [thread:$0]  %s427_s5, 16, %s758_s7, [#allocation4]  }
 0x2c5   :  { %574 = dma.done.wait [#allocation4], 16  }
 0x2c6   :  { %575 = vsyncadd [#allocation4], 4294967280 }
 0x2c7   :  { %433 = vsyncpa [#allocation4], 1 }

</bundles_post_ra>
